<compile_context>
chip_gen: v7x
topology: tpu7x:2x2x1
jax: 0.10.0
libtpu: 0.0.40
codegen_flags: <defaults>
</compile_context>

<pallas_src>
import functools

import jax
import jax.numpy as jnp
import numpy as np
from jax.experimental import pallas as pl
from jax.experimental.pallas import tpu as pltpu

HIDDEN = 64


def _round_up(x, m):
    return ((x + m - 1) // m) * m


def _pick_bb(batch, block_b):
    """Pick a batch block that is a multiple of 8, divides round_up(B, 8),
    is <= block_b, and (when possible) yields >=2 grid steps (v7x dual-TC)."""
    b8 = _round_up(batch, 8)
    m = b8 // 8
    cap = max(1, min(block_b // 8, m))
    if m >= 2:
        cap = min(cap, (m + 1) // 2)   # prefer >=2 parallel blocks
    d = 1
    for c in range(cap, 0, -1):
        if m % c == 0:
            d = c
            break
    return 8 * d, b8


def _actor_kernel(x_ref, w1_ref, b1_ref, w2_ref, b2_ref, wh_ref, bh_ref,
                  out_ref, *, a_dim):
    x = x_ref[...]

    # fc1 + ReLU (f32 accumulation on the MXU; biases already f32)
    h1 = jnp.dot(x, w1_ref[...], preferred_element_type=jnp.float32)
    h1 = jnp.maximum(h1 + b1_ref[...], 0.0)
    h1 = h1.astype(w2_ref.dtype)

    # fc2 + ReLU
    h2 = jnp.dot(h1, w2_ref[...], preferred_element_type=jnp.float32)
    h2 = jnp.maximum(h2 + b2_ref[...], 0.0)
    h2 = h2.astype(wh_ref.dtype)

    # Fused mu|sigma head: one matmul, lane-masked epilogue.
    z = jnp.dot(h2, wh_ref[...], preferred_element_type=jnp.float32)
    z = z + bh_ref[...]
    mu = jnp.tanh(z)                                              # EUP
    sp = jnp.maximum(z, 0.0) + jnp.log1p(jnp.exp(-jnp.abs(z)))    # stable softplus
    lane = jax.lax.broadcasted_iota(jnp.int32, z.shape, dimension=1)
    out_ref[...] = jnp.where(lane < a_dim, mu, sp).astype(out_ref.dtype)


def prepare_actor_params(params, dtype=jnp.float32):
    """One-time padding / head fusion of the parameters (call outside the hot
    loop). Weights are stored [in_features, out_features]."""
    w1, b1 = params["w1"], params["b1"]
    w2, b2 = params["w2"], params["b2"]
    wmu, bmu = params["wmu"], params["bmu"]
    wsg, bsg = params["wsg"], params["bsg"]

    F, H = w1.shape
    A = wmu.shape[1]
    Hp = _round_up(H, 128)
    Aout = _round_up(2 * A, 128)

    w1p = jnp.zeros((F, Hp), dtype).at[:, :H].set(w1.astype(dtype))
    b1p = jnp.zeros((1, Hp), jnp.float32).at[0, :H].set(b1.astype(jnp.float32))
    w2p = jnp.zeros((Hp, Hp), dtype).at[:H, :H].set(w2.astype(dtype))
    b2p = jnp.zeros((1, Hp), jnp.float32).at[0, :H].set(b2.astype(jnp.float32))
    # Fused head: mu in lanes [0:A], sigma in lanes [A:2A].
    whp = (jnp.zeros((Hp, Aout), dtype)
           .at[:H, :A].set(wmu.astype(dtype))
           .at[:H, A:2 * A].set(wsg.astype(dtype)))
    bhp = (jnp.zeros((1, Aout), jnp.float32)
           .at[0, :A].set(bmu.astype(jnp.float32))
           .at[0, A:2 * A].set(bsg.astype(jnp.float32)))

    return dict(w1p=w1p, b1p=b1p, w2p=w2p, b2p=b2p, whp=whp, bhp=bhp,
                a_dim=int(A))


@functools.partial(jax.jit, static_argnames=("a_dim", "block_b"))
def _actor_forward_padded(x, w1p, b1p, w2p, b2p, whp, bhp, *, a_dim,
                          block_b=512):
    B, F = x.shape
    Hp = w1p.shape[1]
    Aout = whp.shape[1]
    dtype = x.dtype

    bb, B8 = _pick_bb(B, block_b)
    if B8 != B:  # only x (the per-call array) ever gets padded, and only rows
        x = jnp.zeros((B8, F), dtype).at[:B].set(x)

    const = lambda i: (0, 0)  # weights/biases: same block every step -> VMEM-resident
    out = pl.pallas_call(
        functools.partial(_actor_kernel, a_dim=a_dim),
        out_shape=jax.ShapeDtypeStruct((B8, Aout), dtype),
        grid=(B8 // bb,),
        in_specs=[
            pl.BlockSpec((bb, F), lambda i: (i, 0)),   # x: streamed over batch, F unpadded
            pl.BlockSpec((F, Hp), const),              # W1
            pl.BlockSpec((1, Hp), const),              # b1 (f32)
            pl.BlockSpec((Hp, Hp), const),             # W2
            pl.BlockSpec((1, Hp), const),              # b2 (f32)
            pl.BlockSpec((Hp, Aout), const),           # W_head = [Wmu | Wsig]
            pl.BlockSpec((1, Aout), const),            # b_head (f32)
        ],
        out_specs=pl.BlockSpec((bb, Aout), lambda i: (i, 0)),
        compiler_params=pltpu.CompilerParams(
            dimension_semantics=("parallel",)),
    )(x, w1p, b1p, w2p, b2p, whp, bhp)

    mu = out[:B, :a_dim]
    sigma = out[:B, a_dim:2 * a_dim]
    return mu, sigma


def actor_forward(x, prepared, block_b=512):
    """prepared = prepare_actor_params(params); returns (mu, sigma)."""
    return _actor_forward_padded(
        x, prepared["w1p"], prepared["b1p"], prepared["w2p"], prepared["b2p"],
        prepared["whp"], prepared["bhp"],
        a_dim=prepared["a_dim"], block_b=block_b)


def _reference_forward(x, params):
    h1 = jnp.maximum(x @ params["w1"] + params["b1"], 0.0)
    h2 = jnp.maximum(h1 @ params["w2"] + params["b2"], 0.0)
    mu = jnp.tanh(h2 @ params["wmu"] + params["bmu"])
    sg = jax.nn.softplus(h2 @ params["wsg"] + params["bsg"])
    return mu, sg


if __name__ == "__main__":
    key = jax.random.PRNGKey(0)
    batch, feature_dim, action_dim = 4, 8, 2
    dtype = jnp.float32
    keys = jax.random.split(key, 8)

    def linear_init(k, fan_in, fan_out):
        bound = 1.0 / np.sqrt(fan_in)
        kw, kb = jax.random.split(k)
        w = jax.random.uniform(kw, (fan_in, fan_out), dtype, -bound, bound)
        b = jax.random.uniform(kb, (fan_out,), dtype, -bound, bound)
        return w, b

    w1, b1 = linear_init(keys[0], feature_dim, HIDDEN)
    w2, b2 = linear_init(keys[1], HIDDEN, HIDDEN)
    _, bmu = linear_init(keys[2], HIDDEN, action_dim)
    _, bsg = linear_init(keys[3], HIDDEN, action_dim)
    # mimic nn.init.uniform_(weight, -0.001, 0.001) on the mu / sigma heads
    wmu = jax.random.uniform(keys[4], (HIDDEN, action_dim), dtype, -1e-3, 1e-3)
    wsg = jax.random.uniform(keys[5], (HIDDEN, action_dim), dtype, -1e-3, 1e-3)
    x = jax.random.normal(keys[6], (batch, feature_dim), dtype)

    params = dict(w1=w1, b1=b1, w2=w2, b2=b2,
                  wmu=wmu, bmu=bmu, wsg=wsg, bsg=bsg)

    prepared = prepare_actor_params(params, dtype)   # one-time padding / fusion
    mu, sigma = actor_forward(x, prepared)
    jax.block_until_ready((mu, sigma))

    mu_ref, sg_ref = _reference_forward(x, params)
    np.testing.assert_allclose(np.asarray(mu), np.asarray(mu_ref),
                               rtol=1e-5, atol=1e-5)
    np.testing.assert_allclose(np.asarray(sigma), np.asarray(sg_ref),
                               rtol=1e-5, atol=1e-5)

    print("KERNEL_OK")
</pallas_src>

<mosaic_0001>
module attributes {stable_mosaic.version = 11 : i64} {
  func.func @_actor_kernel(%arg0: i32, %arg1: memref<8x8xf32, #tpu.memory_space<vmem>>, %arg2: memref<8x128xf32, #tpu.memory_space<vmem>>, %arg3: memref<1x128xf32, #tpu.memory_space<vmem>>, %arg4: memref<128x128xf32, #tpu.memory_space<vmem>>, %arg5: memref<1x128xf32, #tpu.memory_space<vmem>>, %arg6: memref<128x128xf32, #tpu.memory_space<vmem>>, %arg7: memref<1x128xf32, #tpu.memory_space<vmem>>, %arg8: memref<8x128xf32, #tpu.memory_space<vmem>>) attributes {dimension_semantics = [#tpu.dimension_semantics<parallel>], iteration_bounds = array<i64: 1>, scalar_prefetch = 0 : i64, scratch_operands = 0 : i64, tpu.core_type = #tpu.core_type<tc>, window_params = [{transform_indices = @transform_0, window_bounds = array<i64: 8, 8>}, {pipeline_mode = #tpu.pipeline_mode<synchronous>, transform_indices = @transform_1, window_bounds = array<i64: 8, 128>}, {pipeline_mode = #tpu.pipeline_mode<synchronous>, transform_indices = @transform_2, window_bounds = array<i64: 1, 128>}, {pipeline_mode = #tpu.pipeline_mode<synchronous>, transform_indices = @transform_3, window_bounds = array<i64: 128, 128>}, {pipeline_mode = #tpu.pipeline_mode<synchronous>, transform_indices = @transform_4, window_bounds = array<i64: 1, 128>}, {pipeline_mode = #tpu.pipeline_mode<synchronous>, transform_indices = @transform_5, window_bounds = array<i64: 128, 128>}, {pipeline_mode = #tpu.pipeline_mode<synchronous>, transform_indices = @transform_6, window_bounds = array<i64: 1, 128>}, {transform_indices = @transform_7, window_bounds = array<i64: 8, 128>}]} {
    %c0 = arith.constant 0 : index
    %c0_0 = arith.constant 0 : index
    %0 = vector.load %arg1[%c0, %c0_0] : memref<8x8xf32, #tpu.memory_space<vmem>>, vector<8x8xf32>
    %c0_1 = arith.constant 0 : index
    %c0_2 = arith.constant 0 : index
    %1 = vector.load %arg2[%c0_1, %c0_2] : memref<8x128xf32, #tpu.memory_space<vmem>>, vector<8x128xf32>
    %cst = arith.constant dense<0.000000e+00> : vector<8x128xf32>
    %2 = tpu.matmul %0, %1, %cst {dimension_numbers = #tpu.dot_dimension_numbers<[1], [0], [0], [1], [0, 0, 1, 1], [], []>} : vector<8x8xf32>, vector<8x128xf32>, vector<8x128xf32> -> vector<8x128xf32>
    %c0_3 = arith.constant 0 : index
    %c0_4 = arith.constant 0 : index
    %3 = vector.load %arg3[%c0_3, %c0_4] : memref<1x128xf32, #tpu.memory_space<vmem>>, vector<1x128xf32>
    %4 = vector.broadcast %3 : vector<1x128xf32> to vector<8x128xf32>
    %5 = arith.addf %2, %4 : vector<8x128xf32>
    %cst_5 = arith.constant 0.000000e+00 : f32
    %6 = vector.broadcast %cst_5 : f32 to vector<8x128xf32>
    %7 = arith.maximumf %5, %6 : vector<8x128xf32>
    %c0_6 = arith.constant 0 : index
    %c0_7 = arith.constant 0 : index
    %8 = vector.load %arg4[%c0_6, %c0_7] : memref<128x128xf32, #tpu.memory_space<vmem>>, vector<128x128xf32>
    %cst_8 = arith.constant dense<0.000000e+00> : vector<8x128xf32>
    %9 = tpu.matmul %7, %8, %cst_8 {dimension_numbers = #tpu.dot_dimension_numbers<[1], [0], [0], [1], [0, 0, 1, 1], [], []>} : vector<8x128xf32>, vector<128x128xf32>, vector<8x128xf32> -> vector<8x128xf32>
    %c0_9 = arith.constant 0 : index
    %c0_10 = arith.constant 0 : index
    %10 = vector.load %arg5[%c0_9, %c0_10] : memref<1x128xf32, #tpu.memory_space<vmem>>, vector<1x128xf32>
    %11 = vector.broadcast %10 : vector<1x128xf32> to vector<8x128xf32>
    %12 = arith.addf %9, %11 : vector<8x128xf32>
    %cst_11 = arith.constant 0.000000e+00 : f32
    %13 = vector.broadcast %cst_11 : f32 to vector<8x128xf32>
    %14 = arith.maximumf %12, %13 : vector<8x128xf32>
    %c0_12 = arith.constant 0 : index
    %c0_13 = arith.constant 0 : index
    %15 = vector.load %arg6[%c0_12, %c0_13] : memref<128x128xf32, #tpu.memory_space<vmem>>, vector<128x128xf32>
    %cst_14 = arith.constant dense<0.000000e+00> : vector<8x128xf32>
    %16 = tpu.matmul %14, %15, %cst_14 {dimension_numbers = #tpu.dot_dimension_numbers<[1], [0], [0], [1], [0, 0, 1, 1], [], []>} : vector<8x128xf32>, vector<128x128xf32>, vector<8x128xf32> -> vector<8x128xf32>
    %c0_15 = arith.constant 0 : index
    %c0_16 = arith.constant 0 : index
    %17 = vector.load %arg7[%c0_15, %c0_16] : memref<1x128xf32, #tpu.memory_space<vmem>>, vector<1x128xf32>
    %18 = vector.broadcast %17 : vector<1x128xf32> to vector<8x128xf32>
    %19 = arith.addf %16, %18 : vector<8x128xf32>
    %20 = math.tanh %19 : vector<8x128xf32>
    %cst_17 = arith.constant 0.000000e+00 : f32
    %21 = vector.broadcast %cst_17 : f32 to vector<8x128xf32>
    %22 = arith.maximumf %19, %21 : vector<8x128xf32>
    %23 = math.absf %19 : vector<8x128xf32>
    %cst_18 = arith.constant 0.000000e+00 : f32
    %24 = vector.broadcast %cst_18 : f32 to vector<8x128xf32>
    %25 = arith.subf %24, %23 : vector<8x128xf32>
    %26 = math.exp %25 : vector<8x128xf32>
    %27 = math.log1p %26 : vector<8x128xf32>
    %28 = arith.addf %22, %27 : vector<8x128xf32>
    %29 = tpu.iota {dimensions = array<i32: 1>} : vector<8x128xi32>
    %c2_i32 = arith.constant 2 : i32
    %30 = vector.broadcast %c2_i32 : i32 to vector<8x128xi32>
    %31 = arith.cmpi slt, %29, %30 : vector<8x128xi32>
    %32 = arith.select %31, %20, %28 : vector<8x128xi1>, vector<8x128xf32>
    %c0_19 = arith.constant 0 : index
    %c0_20 = arith.constant 0 : index
    %33 = vector.load %arg8[%c0_19, %c0_20] : memref<8x128xf32, #tpu.memory_space<vmem>>, vector<8x128xf32>
    tpu.vector_store %arg8[%c0_19, %c0_20], %32 {strides = array<i32>} : memref<8x128xf32, #tpu.memory_space<vmem>>, vector<8x128xf32>,
    return
  }
  func.func @transform_0(%arg0: i32) -> (i32, i32) {
    %c0_i32 = arith.constant 0 : i32
    %c0_i32_0 = arith.constant 0 : i32
    return %arg0, %c0_i32 : i32, i32
  }
  func.func @transform_1(%arg0: i32) -> (i32, i32) {
    %c0_i32 = arith.constant 0 : i32
    %c0_i32_0 = arith.constant 0 : i32
    %c0_i32_1 = arith.constant 0 : i32
    return %c0_i32, %c0_i32_0 : i32, i32
  }
  func.func @transform_2(%arg0: i32) -> (i32, i32) {
    %c0_i32 = arith.constant 0 : i32
    %c0_i32_0 = arith.constant 0 : i32
    %c0_i32_1 = arith.constant 0 : i32
    return %c0_i32, %c0_i32_0 : i32, i32
  }
  func.func @transform_3(%arg0: i32) -> (i32, i32) {
    %c0_i32 = arith.constant 0 : i32
    %c0_i32_0 = arith.constant 0 : i32
    %c0_i32_1 = arith.constant 0 : i32
    return %c0_i32, %c0_i32_0 : i32, i32
  }
  func.func @transform_4(%arg0: i32) -> (i32, i32) {
    %c0_i32 = arith.constant 0 : i32
    %c0_i32_0 = arith.constant 0 : i32
    %c0_i32_1 = arith.constant 0 : i32
    return %c0_i32, %c0_i32_0 : i32, i32
  }
  func.func @transform_5(%arg0: i32) -> (i32, i32) {
    %c0_i32 = arith.constant 0 : i32
    %c0_i32_0 = arith.constant 0 : i32
    %c0_i32_1 = arith.constant 0 : i32
    return %c0_i32, %c0_i32_0 : i32, i32
  }
  func.func @transform_6(%arg0: i32) -> (i32, i32) {
    %c0_i32 = arith.constant 0 : i32
    %c0_i32_0 = arith.constant 0 : i32
    %c0_i32_1 = arith.constant 0 : i32
    return %c0_i32, %c0_i32_0 : i32, i32
  }
  func.func @transform_7(%arg0: i32) -> (i32, i32) {
    %c0_i32 = arith.constant 0 : i32
    %c0_i32_0 = arith.constant 0 : i32
    return %arg0, %c0_i32 : i32, i32
  }
}

</mosaic_0001>

<bundles_post_ra>
// kernel: _actor_forward_padded.1
= control target key start
LH: loop header
LB: loop body
LE: loop exit
PB: predicated region body
PF: predicated region fallthrough
CT: control target
= control target key end

     0   :  { %12 = vsyncpa [#allocation3], 0  ;;  %s684_s0 = inlined_call_operand.vmem [shape: f32[8,8], index: 0, kind: input, shape index: {}]   ;;  %s685_s1 = inlined_call_operand.vmem [shape: f32[8,128], index: 1, kind: input, shape index: {}]   ;;  %s686_s2 = inlined_call_operand.vmem [shape: f32[1,128], index: 2, kind: input, shape index: {}]   ;;  %s687_s3 = inlined_call_operand.hbm [shape: f32[128,128], index: 3, kind: input, shape index: {}]   ;;  %s688_s4 = inlined_call_operand.vmem [shape: f32[1,128], index: 4, kind: input, shape index: {}]   ;;  %s689_s5 = inlined_call_operand.hbm [shape: f32[128,128], index: 5, kind: input, shape index: {}]   ;;  %s690_s6 = inlined_call_operand.vmem [shape: f32[1,128], index: 6, kind: input, shape index: {}]   ;;  %s691_s7 = inlined_call_operand.vmem [shape: f32[8,128], index: 7, kind: output, shape index: {}]  }
   0x1   :  { %13 = vsyncpa [#allocation5], 0  ;;  %s576_s24 = smov [#allocation2]   ;;  %s528_s28 = scalar_lea.hbm %s687_s3, 2048 }
   0x2   :  { %s25_s25 = sshll.u32 %s576_s24, 4  ;;  %p529_p0 = scmp.ne.s32.totalorder %s687_s3, %s528_s28  ;;  %s26_s25 = int_to_ptr.vmem [resolvable:$true] %s25_s25 }
   0x3   :  { %p532_p1 = scmp.lt.u32.totalorder %s528_s28, %s687_s3 }
   0x5   :  { %p534_p2 = pnand %p532_p1, %p529_p0 }
   0x7   :  { %537 = shalt.err (!%p534_p2)
}
   0x8   :  { %s538_s10 = scalar_lea.vmem %s26_s25, 2048  ;;  %p543_p4 = scmp.lt.s32.totalorder %s26_s25, %s26_s25 }
   0x9   :  { %p539_p3 = scmp.ne.s32.totalorder %s26_s25, %s538_s10  ;;  %p544_p5 = scmp.lt.s32.totalorder %s538_s10, %s538_s10 }
   0xb   :  { %p545_p6 = por %p544_p5, %p543_p4 }
   0xd   :  { %p546_p7 = pnand %p545_p6, %p539_p3 }
   0xf   :  { %549 = shalt.err (!%p546_p7)
}
  0x10   :  { %s577_s11 = smov 128   ;;  %s578_s12 = smov 8  }
  0x11   :  { %31 = dma.hbm_to_vmem [thread:$0]  %s687_s3, 2048, %s26_s25, [#allocation3], %s577_s11, %s577_s11, %s578_s12  }
  0x12   :  { %s579_s15 = smov [#allocation4]   ;;  %s550_s19 = scalar_lea.hbm %s689_s5, 2048 }
  0x13   :  { %s39_s16 = sshll.u32 %s579_s15, 4  ;;  %p551_p8 = scmp.ne.s32.totalorder %s689_s5, %s550_s19  ;;  %s40_s16 = int_to_ptr.vmem [resolvable:$true] %s39_s16 }
  0x14   :  { %p554_p9 = scmp.lt.u32.totalorder %s550_s19, %s689_s5 }
  0x16   :  { %p556_p10 = pnand %p554_p9, %p551_p8 }
  0x18   :  { %559 = shalt.err (!%p556_p10)
}
  0x19   :  { %s560_s24 = scalar_lea.vmem %s40_s16, 2048  ;;  %p565_p12 = scmp.lt.s32.totalorder %s40_s16, %s40_s16 }
  0x1a   :  { %p561_p11 = scmp.ne.s32.totalorder %s40_s16, %s560_s24  ;;  %p566_p13 = scmp.lt.s32.totalorder %s560_s24, %s560_s24 }
  0x1c   :  { %p567_p0 = por %p566_p13, %p565_p12 }
  0x1e   :  { %p568_p1 = pnand %p567_p0, %p561_p11 }
  0x20   :  { %571 = shalt.err (!%p568_p1)
}
  0x21   :  { %45 = dma.hbm_to_vmem [thread:$0]  %s689_s5, 2048, %s40_s16, [#allocation5], %s577_s11, %s577_s11, %s578_s12  }
  0x22   :  { %572 = dma.done.wait [#allocation3], 2048  }
  0x23   :  { %573 = vsyncadd [#allocation3], 4294965248 }
  0x24   :  { %574 = dma.done.wait [#allocation5], 2048  }
  0x25   :  { %575 = vsyncadd [#allocation5], 4294965248  ;;  %v580_v0 = vmov 0.0   ;;  %vm581_vm0 = vmmov 0   ;;  %v582_v1 = vmov 0.0|0.0   ;;  %vm63_vm1 = vcmask 64512  }
  0x26   :  { %392 = vmatprep.subr.mxu0 %v580_v0  ;;  %394 = vmatprep.mubr.msk.f32.mxu0 %vm581_vm0, %v580_v0  ;;  %v55_v2 = vld [vmem:[%s685_s1] sm:$0xff]  ;;  %v139_v5 = vld [vmem:[#allocation2 + $0x8] sm:$0xff]  ;;  %v140_v6 = vld [vmem:[#allocation2 + $0x10] sm:$0xff] }
  0x27   :  { %467 = vmatprep.subr.bf16.mxu1 %v582_v1  ;;  %429 = vmatprep.mubr.msk.f32.mxu1 %vm581_vm0, %v580_v0  ;;  %v54_v3 = vld [vmem:[%s684_s0] sm:$0xff]  ;;  %v141_v7 = vld [vmem:[#allocation2 + $0x18] sm:$0xff]  ;;  %v143_v11 = vld [vmem:[#allocation2 + $0x28] sm:$0xff] }
  0x28   :  { %v138_v4 = vld [vmem:[#allocation2] sm:$0xff]  ;;  %393 = vmatpush3.msra.mxu0 %v55_v2  ;;  %v471_v9 = vpack.c.bf16 %v141_v7, %v140_v6  ;;  %v144_v13 = vld [vmem:[#allocation2 + $0x30] sm:$0xff]  ;;  %v145_v14 = vld [vmem:[#allocation2 + $0x38] sm:$0xff] }
  0x29   :  { %395 = vmatmul.mubr.msk.f32.vlgmr.msra.gmra.mrb[0].mxu0 %vm63_vm1, %v54_v3  ;;  %v468_v8 = vpack.c.bf16 %v139_v5, %v138_v4  ;;  %491 = vmatprep.subr.bf16.mxu0 %v582_v1  ;;  %v142_v10 = vld [vmem:[#allocation2 + $0x20] sm:$0xff]  ;;  %v477_v15 = vpack.c.bf16 %v145_v14, %v144_v13  ;;  %v147_v17 = vld [vmem:[#allocation2 + $0x48] sm:$0xff]  ;;  %v148_v19 = vld [vmem:[#allocation2 + $0x50] sm:$0xff] }
  0x2a   :  { %464 = vmatprep.mubr.msk.f32.mxu0 %vm581_vm0, %v580_v0  ;;  %v474_v12 = vpack.c.bf16 %v143_v11, %v142_v10  ;;  %v146_v16 = vld [vmem:[#allocation2 + $0x40] sm:$0xff]  ;;  %v149_v20 = vld [vmem:[#allocation2 + $0x58] sm:$0xff]  ;;  %v151_v23 = vld [vmem:[#allocation2 + $0x68] sm:$0xff] }
  0x2b   :  { %469 = vmatpush3.bf16.msra.mxu1 %v468_v8  ;;  %v480_v18 = vpack.c.bf16 %v147_v17, %v146_v16  ;;  %v483_v21 = vpack.c.bf16 %v149_v20, %v148_v19  ;;  %v150_v22 = vld [vmem:[#allocation2 + $0x60] sm:$0xff]  ;;  %v152_v25 = vld [vmem:[#allocation2 + $0x70] sm:$0xff]  ;;  %v153_v26 = vld [vmem:[#allocation2 + $0x78] sm:$0xff]  ;;  %v341_v8 = vlaneseq }
  0x2c   :  { %470 = vmatprep.subr.bf16.mxu1 %v582_v1  ;;  %v486_v24 = vpack.c.bf16 %v151_v23, %v150_v22  ;;  %v489_v27 = vpack.c.bf16 %v153_v26, %v152_v25  ;;  %v232_v28 = vld [vmem:[#allocation4] sm:$0xff]  ;;  %v233_v29 = vld [vmem:[#allocation4 + $0x8] sm:$0xff]  ;;  %v234_v30 = vld [vmem:[#allocation4 + $0x10] sm:$0xff] }
  0x2d   :  { %v492_v31 = vpack.c.bf16 %v233_v29, %v232_v28  ;;  %v235_v32 = vld [vmem:[#allocation4 + $0x18] sm:$0xff]  ;;  %v236_v34 = vld [vmem:[#allocation4 + $0x20] sm:$0xff]  ;;  %v237_v35 = vld [vmem:[#allocation4 + $0x28] sm:$0xff]  ;;  %v342_v11 = vand.u32 127, %v341_v8 }
  0x2e   :  { %v495_v33 = vpack.c.bf16 %v235_v32, %v234_v30  ;;  %v498_v36 = vpack.c.bf16 %v237_v35, %v236_v34  ;;  %v238_v37 = vld [vmem:[#allocation4 + $0x30] sm:$0xff]  ;;  %v239_v38 = vld [vmem:[#allocation4 + $0x38] sm:$0xff]  ;;  %v240_v40 = vld [vmem:[#allocation4 + $0x40] sm:$0xff] }
  0x2f   :  { %472 = vmatpush3.bf16.msra.mxu1 %v471_v9  ;;  %493 = vmatpush3.bf16.msra.mxu0 %v492_v31  ;;  %v501_v39 = vpack.c.bf16 %v239_v38, %v238_v37  ;;  %v241_v41 = vld [vmem:[#allocation4 + $0x48] sm:$0xff]  ;;  %v242_v43 = vld [vmem:[#allocation4 + $0x50] sm:$0xff]  ;;  %v243_v44 = vld [vmem:[#allocation4 + $0x58] sm:$0xff]  ;;  %vm343_vm3 = vcmp.lt.s32.totalorder %v342_v11, 2 }
  0x30   :  { %473 = vmatprep.subr.bf16.mxu1 %v582_v1  ;;  %494 = vmatprep.subr.bf16.mxu0 %v582_v1  ;;  %v504_v42 = vpack.c.bf16 %v241_v41, %v240_v40  ;;  %v507_v45 = vpack.c.bf16 %v243_v44, %v242_v43  ;;  %v244_v46 = vld [vmem:[#allocation4 + $0x60] sm:$0xff]  ;;  %v245_v47 = vld [vmem:[#allocation4 + $0x68] sm:$0xff]  ;;  %v246_v54 = vld [vmem:[#allocation4 + $0x70] sm:$0xff] }
  0x31   :  { %v510_v48 = vpack.c.bf16 %v245_v47, %v244_v46  ;;  %v352_v49 = vld [vmem:[%s686_s2] ss:$0 sm:$0xff]  ;;  %v247_v55 = vld [vmem:[#allocation4 + $0x78] sm:$0xff] }
  0x32   :  { %v513_v56 = vpack.c.bf16 %v247_v55, %v246_v54  ;;  %v354_v57 = vld [vmem:[%s688_s4] ss:$0 sm:$0xff] }
  0x33   :  { %475 = vmatpush3.bf16.msra.mxu1 %v474_v12  ;;  %496 = vmatpush3.bf16.msra.mxu0 %v495_v33  ;;  %v355_v62 = vld [vmem:[%s690_s6] ss:$0 sm:$0xff] }
  0x34   :  { %476 = vmatprep.subr.bf16.mxu1 %v582_v1  ;;  %497 = vmatprep.subr.bf16.mxu0 %v582_v1 }
  0x37   :  { %478 = vmatpush3.bf16.msra.mxu1 %v477_v15  ;;  %499 = vmatpush3.bf16.msra.mxu0 %v498_v36 }
  0x38   :  { %479 = vmatprep.subr.bf16.mxu1 %v582_v1  ;;  %500 = vmatprep.subr.bf16.mxu0 %v582_v1 }
  0x3b   :  { %481 = vmatpush3.bf16.msra.mxu1 %v480_v18  ;;  %502 = vmatpush3.bf16.msra.mxu0 %v501_v39 }
  0x3c   :  { %482 = vmatprep.subr.bf16.mxu1 %v582_v1  ;;  %503 = vmatprep.subr.bf16.mxu0 %v582_v1 }
  0x3f   :  { %484 = vmatpush3.bf16.msra.mxu1 %v483_v21  ;;  %505 = vmatpush3.bf16.msra.mxu0 %v504_v42 }
  0x40   :  { %485 = vmatprep.subr.bf16.mxu1 %v582_v1  ;;  %506 = vmatprep.subr.bf16.mxu0 %v582_v1 }
  0x43   :  { %487 = vmatpush3.bf16.msra.mxu1 %v486_v24  ;;  %508 = vmatpush3.bf16.msra.mxu0 %v507_v45 }
  0x44   :  { %488 = vmatprep.subr.bf16.mxu1 %v582_v1  ;;  %509 = vmatprep.subr.bf16.mxu0 %v582_v1 }
  0x47   :  { %490 = vmatpush3.bf16.msra.mxu1 %v489_v27  ;;  %511 = vmatpush3.bf16.msra.mxu0 %v510_v48 }
  0x48   :  { %512 = vmatprep.subr.bf16.mxu0 %v582_v1 }
  0x4b   :  { %514 = vmatpush3.bf16.msra.mxu0 %v513_v56 }
  0xfc   :  { %v133_v50 = vpop.f32.mrb[0].mxu0 }
  0xfd   :  { %v134_v51 = vadd.f32 %v352_v49, %v133_v50  ;;  %v396_v52 = vpop.f32.mrb[1].mxu0 }
  0xff   :  { %v137_v53 = vmax.f32 %v134_v51, 0.0 }
 0x101   :  { %430 = vmatmul.mubr.f32.vlgmr.msra.gmra.mrb[0].mxu1 %v137_v53 }
 0x1d4   :  { %v227_v58 = vpop.f32.mrb[0].mxu1 }
 0x1d5   :  { %v228_v59 = vadd.f32 %v354_v57, %v227_v58  ;;  %v431_v60 = vpop.f32.mrb[1].mxu1 }
 0x1d7   :  { %v231_v61 = vmax.f32 %v228_v59, 0.0 }
 0x1d9   :  { %465 = vmatmul.mubr.f32.vlgmr.msra.gmra.mrb[2].mxu0 %v231_v61 }
 0x2ac   :  { %v321_v63 = vpop.f32.mrb[2].mxu0 }
 0x2ad   :  { %v322_v0 = vadd.f32 %v355_v62, %v321_v63  ;;  %v466_v1 = vpop.f32.mrb[3].mxu0 }
 0x2af   :  { %v327_v2 = vand.u32 2147483647, %v322_v0  ;;  %v326_v15 = vmax.f32 %v322_v0, 0.0 }
 0x2b1   :  { %v328_v3 = vsub.f32 0.0, %v327_v2 }
 0x2b3   :  { %v329_v4 = vmul.f32 1.442695, %v328_v3 }
 0x2b5   :  { %522 = vpow2.f32 %v329_v4 }
 0x2bf   :  { %v523_v5 = vpop.eup %522 }
 0x2c0   :  { %v331_v6 = vadd.f32 1.0, %v523_v5  ;;  %v334_v7 = vmul.f32 -0.5, %v523_v5  ;;  %v337_v10 = vand.u32 2147483647, %v523_v5 }
 0x2c2   :  { %524 = vlog2.f32 %v331_v6  ;;  %v335_v9 = vadd.f32 1.0, %v334_v7  ;;  %vm338_vm2 = vcmp.lt.f32.partialorder %v337_v10, 0.0004427343 }
 0x2c3   :  { %526 = vtanh.f32 %v322_v0 }
 0x2c4   :  { %v336_v14 = vmul.f32 %v523_v5, %v335_v9 }
 0x2cc   :  { %v525_v12 = vpop.eup %524 }
 0x2cd   :  { %v333_v13 = vmul.f32 0.6931472, %v525_v12  ;;  %v527_v18 = vpop.eup %526 }
 0x2cf   :  { %v339_v16 = vsel %vm338_vm2, %v336_v14, %v333_v13 }
 0x2d0   :  { %v340_v17 = vadd.f32 %v339_v16, %v326_v15 }
 0x2d2   :  { %v344_v19 = vsel %vm343_vm3, %v527_v18, %v340_v17 }
 0x2d3   :  { %345 = vst [vmem:[%s691_s7] sm:$0xff] %v344_v19 }
 0x2d4   :  { %350 = vsyncpa [#allocation3], 1 }
 0x2d5   :  { %351 = vsyncpa [#allocation5], 1 }

</bundles_post_ra>
